<compile_context>
chip_gen: v7x
topology: tpu7x:2x2x1
jax: 0.10.0
libtpu: 0.0.40
codegen_flags: <defaults>
</compile_context>

<pallas_src>
import jax
import jax.numpy as jnp
from jax.experimental import pallas as pl
from jax.experimental.pallas import tpu as pltpu

IN_DIM = 10
HID_DIM = 32
OUT_DIM = 7
MAX_TILE_B = 2048   # batch tile (multiple of 8); ~100 KB per-tile VMEM footprint


def _round_up(n, m):
    return ((n + m - 1) // m) * m


def _choose_tiling(B):
    """Return (b_pad, tile_b): b_pad multiple of tile_b, tile_b multiple of 8.

    For b_pad >= 16 we guarantee at least 2 grid steps so the batch axis can
    shard across both TensorCores on v7x and the pipeline has work to overlap.
    """
    b0 = max(8, _round_up(B, 8))
    if b0 < 16:
        return b0, b0                                     # grid = (1,)
    tile_b = min(MAX_TILE_B, _round_up(pl.cdiv(b0, 2), 8))
    b_pad = _round_up(b0, tile_b)
    return b_pad, tile_b


def mlp_kernel(x_ref, w1_ref, b1_ref, w2_ref, b2_ref, o_ref):
    # Fused MLP hot path, all in VMEM:
    # bf16 matmul (f32 acc) -> f32 bias -> ReLU -> bf16 matmul (f32 acc) -> f32 bias.
    x = x_ref[...]                                              # (TB, 10) bf16
    h = jnp.dot(x, w1_ref[...], preferred_element_type=jnp.float32)
    h = jnp.maximum(h + b1_ref[...], 0.0)                       # (TB, 32) f32
    y = jnp.dot(h.astype(jnp.bfloat16), w2_ref[...],
                preferred_element_type=jnp.float32)             # (TB, 7)  f32
    o_ref[...] = (y + b2_ref[...]).astype(o_ref.dtype)


def mlp_forward(x, w1, b1, w2, b2):
    """x: (B, 10) f32; w1: (10, 32); b1: (1, 32); w2: (32, 7); b2: (1, 7)."""
    B = x.shape[0]
    b_pad, tile_b = _choose_tiling(B)

    # Host-side prep (single fused pass): pad batch rows to a tile multiple and
    # cast the heavy operands to bf16.  Biases stay f32.  No column padding.
    x_b = x.astype(jnp.bfloat16)
    x_p = x_b if b_pad == B else jnp.zeros((b_pad, IN_DIM), jnp.bfloat16).at[:B].set(x_b)
    w1_b = w1.astype(jnp.bfloat16)
    w2_b = w2.astype(jnp.bfloat16)

    grid = (b_pad // tile_b,)
    cost = pl.CostEstimate(
        flops=2 * b_pad * (IN_DIM * HID_DIM + HID_DIM * OUT_DIM),
        bytes_accessed=(x_p.size * 2 + w1_b.size * 2 + w2_b.size * 2
                        + b1.size * 4 + b2.size * 4 + b_pad * OUT_DIM * 4),
        transcendentals=0,
    )

    out = pl.pallas_call(
        mlp_kernel,
        out_shape=jax.ShapeDtypeStruct((b_pad, OUT_DIM), jnp.float32),
        grid=grid,
        in_specs=[
            # activations: tiled along batch (last dim == full array dim -> OK)
            pl.BlockSpec((tile_b, IN_DIM), lambda i: (i, 0)),
            # weights / biases: same block index every step -> stay VMEM-resident
            pl.BlockSpec((IN_DIM, HID_DIM), lambda i: (0, 0)),
            pl.BlockSpec((1, HID_DIM), lambda i: (0, 0)),
            pl.BlockSpec((HID_DIM, OUT_DIM), lambda i: (0, 0)),
            pl.BlockSpec((1, OUT_DIM), lambda i: (0, 0)),
        ],
        out_specs=pl.BlockSpec((tile_b, OUT_DIM), lambda i: (i, 0)),
        compiler_params=pltpu.CompilerParams(
            dimension_semantics=("parallel",),  # shard batch across TCs on v7x
        ),
        cost_estimate=cost,
    )(x_p, w1_b, b1, w2_b, b2)

    return out if b_pad == B else out[:B]


def init_params(key):
    # Deterministic init mimicking PyTorch nn.Linear default:
    # U(-1/sqrt(fan_in), 1/sqrt(fan_in)) for both weights and biases.
    k1, k2, k3, k4 = jax.random.split(key, 4)
    bound1 = 1.0 / jnp.sqrt(IN_DIM)
    bound2 = 1.0 / jnp.sqrt(HID_DIM)
    w1 = jax.random.uniform(k1, (IN_DIM, HID_DIM), jnp.float32, -bound1, bound1)
    b1 = jax.random.uniform(k2, (1, HID_DIM), jnp.float32, -bound1, bound1)
    w2 = jax.random.uniform(k3, (HID_DIM, OUT_DIM), jnp.float32, -bound2, bound2)
    b2 = jax.random.uniform(k4, (1, OUT_DIM), jnp.float32, -bound2, bound2)
    return w1, b1, w2, b2


def reference_forward_f32(x, w1, b1, w2, b2):
    h = jnp.maximum(x @ w1 + b1, 0.0)
    return h @ w2 + b2


def reference_forward_bf16(x, w1, b1, w2, b2):
    # Mirrors the kernel's numerics exactly (bf16 operands, f32 accumulation).
    xb = x.astype(jnp.bfloat16)
    w1b = w1.astype(jnp.bfloat16)
    w2b = w2.astype(jnp.bfloat16)
    h = jnp.dot(xb, w1b, preferred_element_type=jnp.float32) + b1
    h = jnp.maximum(h, 0.0).astype(jnp.bfloat16)
    return jnp.dot(h, w2b, preferred_element_type=jnp.float32) + b2


if __name__ == "__main__":
    key = jax.random.PRNGKey(0)
    kx, kx2, kx3, kp = jax.random.split(key, 4)
    w1, b1, w2, b2 = init_params(kp)

    # Small case matching the spec (batch=2, features=10), grid=(1,).
    batch = 2
    x = jax.random.normal(kx, (batch, IN_DIM), jnp.float32)
    out = jax.block_until_ready(mlp_forward(x, w1, b1, w2, b2))
    assert out.shape == (batch, OUT_DIM)
    ref_bf16 = reference_forward_bf16(x, w1, b1, w2, b2)
    ref_f32 = reference_forward_f32(x, w1, b1, w2, b2)
    assert jnp.allclose(out, ref_bf16, atol=1e-4, rtol=1e-4)
    assert jnp.allclose(out, ref_f32, atol=1e-1, rtol=1e-1)

    # Case exercising multi-step grid + remainder row padding.
    batch2 = 1030
    x2 = jax.random.normal(kx2, (batch2, IN_DIM), jnp.float32)
    out2 = jax.block_until_ready(mlp_forward(x2, w1, b1, w2, b2))
    assert out2.shape == (batch2, OUT_DIM)
    ref2 = reference_forward_bf16(x2, w1, b1, w2, b2)
    assert jnp.allclose(out2, ref2, atol=1e-4, rtol=1e-4)

    # Case where B is a multiple of 16: no row padding, no output slice.
    batch3 = 64
    x3 = jax.random.normal(kx3, (batch3, IN_DIM), jnp.float32)
    out3 = jax.block_until_ready(mlp_forward(x3, w1, b1, w2, b2))
    assert out3.shape == (batch3, OUT_DIM)
    ref3 = reference_forward_bf16(x3, w1, b1, w2, b2)
    assert jnp.allclose(out3, ref3, atol=1e-4, rtol=1e-4)

    print("KERNEL_OK")
</pallas_src>

<mosaic_0001>
module attributes {stable_mosaic.version = 11 : i64} {
  func.func @mlp_kernel(%arg0: i32, %arg1: memref<8x10xbf16, #tpu.memory_space<vmem>>, %arg2: memref<10x32xbf16, #tpu.memory_space<vmem>>, %arg3: memref<1x32xf32, #tpu.memory_space<vmem>>, %arg4: memref<32x7xbf16, #tpu.memory_space<vmem>>, %arg5: memref<1x7xf32, #tpu.memory_space<vmem>>, %arg6: memref<8x7xf32, #tpu.memory_space<vmem>>) attributes {dimension_semantics = [#tpu.dimension_semantics<parallel>], iteration_bounds = array<i64: 1>, scalar_prefetch = 0 : i64, scratch_operands = 0 : i64, tpu.core_type = #tpu.core_type<tc>, window_params = [{transform_indices = @transform_0, window_bounds = array<i64: 8, 10>}, {pipeline_mode = #tpu.pipeline_mode<synchronous>, transform_indices = @transform_1, window_bounds = array<i64: 10, 32>}, {pipeline_mode = #tpu.pipeline_mode<synchronous>, transform_indices = @transform_2, window_bounds = array<i64: 1, 32>}, {pipeline_mode = #tpu.pipeline_mode<synchronous>, transform_indices = @transform_3, window_bounds = array<i64: 32, 7>}, {pipeline_mode = #tpu.pipeline_mode<synchronous>, transform_indices = @transform_4, window_bounds = array<i64: 1, 7>}, {transform_indices = @transform_5, window_bounds = array<i64: 8, 7>}]} {
    %c0 = arith.constant 0 : index
    %c0_0 = arith.constant 0 : index
    %0 = vector.load %arg1[%c0, %c0_0] : memref<8x10xbf16, #tpu.memory_space<vmem>>, vector<8x10xbf16>
    %c0_1 = arith.constant 0 : index
    %c0_2 = arith.constant 0 : index
    %1 = vector.load %arg2[%c0_1, %c0_2] : memref<10x32xbf16, #tpu.memory_space<vmem>>, vector<10x32xbf16>
    %cst = arith.constant dense<0.000000e+00> : vector<8x32xf32>
    %2 = tpu.matmul %0, %1, %cst {dimension_numbers = #tpu.dot_dimension_numbers<[1], [0], [0], [1], [0, 0, 1, 1], [], []>} : vector<8x10xbf16>, vector<10x32xbf16>, vector<8x32xf32> -> vector<8x32xf32>
    %c0_3 = arith.constant 0 : index
    %c0_4 = arith.constant 0 : index
    %3 = vector.load %arg3[%c0_3, %c0_4] : memref<1x32xf32, #tpu.memory_space<vmem>>, vector<1x32xf32>
    %4 = vector.broadcast %3 : vector<1x32xf32> to vector<8x32xf32>
    %5 = arith.addf %2, %4 : vector<8x32xf32>
    %cst_5 = arith.constant 0.000000e+00 : f32
    %6 = vector.broadcast %cst_5 : f32 to vector<8x32xf32>
    %7 = arith.maximumf %5, %6 : vector<8x32xf32>
    %8 = arith.truncf %7 : vector<8x32xf32> to vector<8x32xbf16>
    %c0_6 = arith.constant 0 : index
    %c0_7 = arith.constant 0 : index
    %9 = vector.load %arg4[%c0_6, %c0_7] : memref<32x7xbf16, #tpu.memory_space<vmem>>, vector<32x7xbf16>
    %cst_8 = arith.constant dense<0.000000e+00> : vector<8x7xf32>
    %10 = tpu.matmul %8, %9, %cst_8 {dimension_numbers = #tpu.dot_dimension_numbers<[1], [0], [0], [1], [0, 0, 1, 1], [], []>} : vector<8x32xbf16>, vector<32x7xbf16>, vector<8x7xf32> -> vector<8x7xf32>
    %c0_9 = arith.constant 0 : index
    %c0_10 = arith.constant 0 : index
    %11 = vector.load %arg5[%c0_9, %c0_10] : memref<1x7xf32, #tpu.memory_space<vmem>>, vector<1x7xf32>
    %12 = vector.broadcast %11 : vector<1x7xf32> to vector<8x7xf32>
    %13 = arith.addf %10, %12 : vector<8x7xf32>
    %c0_11 = arith.constant 0 : index
    %c0_12 = arith.constant 0 : index
    %14 = vector.load %arg6[%c0_11, %c0_12] : memref<8x7xf32, #tpu.memory_space<vmem>>, vector<8x7xf32>
    tpu.vector_store %arg6[%c0_11, %c0_12], %13 {strides = array<i32>} : memref<8x7xf32, #tpu.memory_space<vmem>>, vector<8x7xf32>,
    return
  }
  func.func @transform_0(%arg0: i32) -> (i32, i32) {
    %c0_i32 = arith.constant 0 : i32
    %c0_i32_0 = arith.constant 0 : i32
    return %arg0, %c0_i32 : i32, i32
  }
  func.func @transform_1(%arg0: i32) -> (i32, i32) {
    %c0_i32 = arith.constant 0 : i32
    %c0_i32_0 = arith.constant 0 : i32
    %c0_i32_1 = arith.constant 0 : i32
    return %c0_i32, %c0_i32_0 : i32, i32
  }
  func.func @transform_2(%arg0: i32) -> (i32, i32) {
    %c0_i32 = arith.constant 0 : i32
    %c0_i32_0 = arith.constant 0 : i32
    %c0_i32_1 = arith.constant 0 : i32
    return %c0_i32, %c0_i32_0 : i32, i32
  }
  func.func @transform_3(%arg0: i32) -> (i32, i32) {
    %c0_i32 = arith.constant 0 : i32
    %c0_i32_0 = arith.constant 0 : i32
    %c0_i32_1 = arith.constant 0 : i32
    return %c0_i32, %c0_i32_0 : i32, i32
  }
  func.func @transform_4(%arg0: i32) -> (i32, i32) {
    %c0_i32 = arith.constant 0 : i32
    %c0_i32_0 = arith.constant 0 : i32
    %c0_i32_1 = arith.constant 0 : i32
    return %c0_i32, %c0_i32_0 : i32, i32
  }
  func.func @transform_5(%arg0: i32) -> (i32, i32) {
    %c0_i32 = arith.constant 0 : i32
    %c0_i32_0 = arith.constant 0 : i32
    return %arg0, %c0_i32 : i32, i32
  }
}

</mosaic_0001>

<bundles_post_ra>
// kernel: tpu_custom_call.1
= control target key start
LH: loop header
LB: loop body
LE: loop exit
PB: predicated region body
PF: predicated region fallthrough
CT: control target
= control target key end

     0   :  { %vm41_vm0 = vcmask 1044480   ;;  %v226_v0 = vmov 0.0   ;;  %vm227_vm1 = vmmov 0   ;;  %vm37_vm2 = vcmask 80896   ;;  %s289_s0 = inlined_call_operand.vmem [shape: bf16[8,10], index: 0, kind: input, shape index: {}]   ;;  %s290_s1 = inlined_call_operand.vmem [shape: bf16[10,32], index: 1, kind: input, shape index: {}]   ;;  %s291_s2 = inlined_call_operand.vmem [shape: f32[1,32], index: 2, kind: input, shape index: {}]   ;;  %s292_s3 = inlined_call_operand.vmem [shape: bf16[32,7], index: 3, kind: input, shape index: {}]   ;;  %s293_s4 = inlined_call_operand.vmem [shape: f32[1,7], index: 4, kind: input, shape index: {}]   ;;  %s294_s5 = inlined_call_operand.hbm [shape: f32[8,7], index: 5, kind: output, shape index: {}]  }
   0x1   :  { %182 = vmatprep.subr.bf16.mxu0 %v226_v0  ;;  %v199_v1 = vld [vmem:[%s290_s1] sm:$0x1f]   ;;  %188 = vmatprep.subr.bf16.mxu1 %v226_v0 }
   0x2   :  { %184 = vmatprep.mubr.msk.bf16.mxu0 %vm227_vm1, %v226_v0  ;;  %192 = vmatprep.mubr.msk.bf16.mxu1 %vm227_vm1, %v226_v0  ;;  %v43_v2 = vsel %vm41_vm0, %v199_v1, 0  ;;  %v22_v3 = vld [vmem:[%s289_s0] sm:$0xf] }
   0x3   :  { %183 = vmatpush3.bf16.msra.mxu0 %v43_v2 }
   0x4   :  { %10 = vsyncpa [#allocation3], 0  ;;  %v200_v4 = vld [vmem:[%s292_s3] sm:$0xff]   ;;  %v201_v5 = vld [vmem:[%s292_s3 + $0x8] sm:$0xff]   ;;  %vm110_vm3 = vcmask 261120   ;;  %s228_s28 = smov [#allocation2]  }
   0x5   :  { %189 = vmatpush3.bf16.msra.mxu1 %v200_v4  ;;  %v170_v6 = vld [vmem:[%s291_s2] ss:$0 sm:$0xff]  ;;  %s162_s3 = sshll.u32 %s228_s28, 4  ;;  %vm154_vm4 = vcmask 56320   ;;  %s163_s3 = int_to_ptr.vmem [resolvable:$true] %s162_s3 }
   0x6   :  { %185 = vmatmul.mubr.msk.bf16.vlgmr.msra.gmra.mrb[0].mxu0 %vm37_vm2, %v22_v3  ;;  %190 = vmatprep.subr.bf16.mxu1 %v226_v0  ;;  %v173_v14 = vld [vmem:[%s293_s4] ss:$0 sm:$0xff]  ;;  %s202_s2 = scalar_lea.vmem %s163_s3, 128  ;;  %p207_p1 = scmp.lt.s32.totalorder %s163_s3, %s163_s3 }
   0x7   :  { %p203_p0 = scmp.ne.s32.totalorder %s163_s3, %s202_s2  ;;  %p208_p2 = scmp.lt.s32.totalorder %s202_s2, %s202_s2 }
   0x9   :  { %191 = vmatpush3.bf16.msra.mxu1 %v201_v5  ;;  %p209_p3 = por %p208_p2, %p207_p1 }
   0xb   :  { %p210_p4 = pnand %p209_p3, %p203_p0 }
  0xd9   :  { %v79_v7 = vpop.f32.mrb[0].mxu0 }
  0xda   :  { %v80_v8 = vadd.f32 %v170_v6, %v79_v7  ;;  %v186_v9 = vpop.f32.mrb[1].mxu0 }
  0xdb   :  { %v82_v10 = vpop.f32.mrb[2].mxu0 }
  0xdc   :  { %v85_v11 = vmax.f32 %v80_v8, 0.0  ;;  %v187_v12 = vpop.f32.mrb[3].mxu0 }
  0xde   :  { %v86_v13 = vpack.c.bf16 %v85_v11, %v85_v11 }
  0xe0   :  { %193 = vmatmul.mubr.msk.bf16.vlgmr.msra.gmra.mrb[0].mxu1 %vm110_vm3, %v86_v13 }
 0x1b3   :  { %v148_v15 = vpop.f32.mrb[0].mxu1 }
 0x1b4   :  { %v149_v16 = vadd.f32 %v173_v14, %v148_v15  ;;  %v194_v17 = vpop.f32.mrb[1].mxu1 }
 0x1b5   :  { %v151_v18 = vpop.f32.mrb[2].mxu1 }
 0x1b6   :  { %v195_v19 = vpop.f32.mrb[3].mxu1  ;;  %155 = vst.msk [vmem:[#allocation2] sm:$0xff] %vm154_vm4, %v149_v16 }
 0x1b7   :  { %213 = shalt.err (!%p210_p4)
}
 0x1b8   :  { %s214_s4 = scalar_lea.hbm %s294_s5, 128 }
 0x1b9   :  { %p215_p5 = scmp.ne.s32.totalorder %s294_s5, %s214_s4  ;;  %p218_p6 = scmp.lt.u32.totalorder %s214_s4, %s294_s5 }
 0x1bb   :  { %p220_p7 = pnand %p218_p6, %p215_p5 }
 0x1bd   :  { %223 = shalt.err (!%p220_p7)
}
 0x1be   :  { %165 = dma.vmem_to_hbm [thread:$0]  %s163_s3, 128, %s294_s5, [#allocation3]  }
 0x1bf   :  { %224 = dma.done.wait [#allocation3], 128  }
 0x1c0   :  { %225 = vsyncadd [#allocation3], 4294967168 }
 0x1c1   :  { %169 = vsyncpa [#allocation3], 1 }

</bundles_post_ra>
